<compile_context>
chip_gen: v7x
topology: tpu7x:2x2x1
jax: 0.10.0
libtpu: 0.0.40
codegen_flags: <defaults>
</compile_context>

<pallas_src>
import functools

import jax
import jax.numpy as jnp
import numpy as np
from jax import lax
from jax.experimental import pallas as pl
from jax.experimental.pallas import tpu as pltpu


def _dist_none_kernel(a_ref, b_ref, dist_ref):
    """(C, TS, 128) tile of points -> (TS, 128) per-point L2 distances."""
    a = a_ref[...].astype(jnp.float32)          # (C, TS, 128)
    b = b_ref[...].astype(jnp.float32)          # (C, TS, 128)
    d = a - b
    # C is the leading (major) dim: this reduce is C-1 dense VALU adds of full
    # (TS, 128) vregs -- no sublane/XLU reduction, no sublane padding.
    dist = jnp.sqrt(jnp.sum(d * d, axis=0))     # (TS, 128), f32
    dist_ref[...] = dist.astype(dist_ref.dtype)


def _dist_sum_kernel(a_ref, b_ref, psum_ref, *, ts, s_valid, ragged):
    """(C, TS, 128) tile -> one masked partial sum written to lane 0 of this
    block's private (1, 128) output slice (no resident accumulator)."""
    a = a_ref[...].astype(jnp.float32)          # (C, TS, 128)
    b = b_ref[...].astype(jnp.float32)
    d = a - b
    dist = jnp.sqrt(jnp.sum(d * d, axis=0))     # (TS, 128), f32

    lane = lax.broadcasted_iota(jnp.int32, (1, 128), 1)

    def store(total):
        psum_ref[...] = jnp.where(lane == 0, total, 0.0)

    if ragged:
        # Only the last grid step can read garbage rows (beyond S); mask them
        # there and keep interior steps free of iota/compare/select work.
        i = pl.program_id(0)
        is_last = i == pl.num_programs(0) - 1

        @pl.when(jnp.logical_not(is_last))
        def _():
            store(jnp.sum(dist))

        @pl.when(is_last)
        def _():
            row = i * ts + lax.broadcasted_iota(jnp.int32, dist.shape, 0)
            # `where` (not multiply) so NaN/Inf garbage is fully discarded.
            store(jnp.sum(jnp.where(row < s_valid, dist, 0.0)))
    else:
        # Sub-128 remainder (if any) was zero-padded in the wrapper -> dist 0.
        store(jnp.sum(dist))


@functools.partial(jax.jit, static_argnames=("reduction", "block_n"))
def lloss(a, b, *, reduction="mean", block_n=262144):
    assert a.shape == b.shape and a.ndim >= 2 and (1 <= a.shape[-1] <= 3), (
        f"Bad shape = {a.shape}"
    )
    assert a.dtype == b.dtype and jnp.issubdtype(a.dtype, jnp.floating), (
        f"Expected matching floating dtypes, got {a.dtype} / {b.dtype}"
    )
    if reduction not in ("none", "sum", "mean"):
        raise ValueError(f"bad reduction={reduction!r} mode")
    assert block_n > 0 and block_n % 1024 == 0, "block_n must be a multiple of 1024"

    lead_shape = a.shape[:-1]
    C = a.shape[-1]
    N = int(np.prod(lead_shape))

    if N == 0:
        # Matches LLoss.forward exactly: empty 'mean' is guarded by
        # `dist.new_zeros(())`; empty 'sum' is 0; 'none' is an empty tensor.
        if reduction == "none":
            return jnp.zeros(lead_shape, a.dtype)
        return jnp.zeros((), a.dtype)

    # Channel-major, lane-dense layout: (C, S, 128) with S = ceil(N / 128).
    # The (N,C)->(C,N) transpose (+ zero pad to a multiple of 128) generally
    # materializes one HBM copy of each input; documented above, not hidden.
    S = pl.cdiv(N, 128)
    pad = S * 128 - N

    def to_tiles(x):
        x2 = jnp.transpose(x.reshape(N, C))            # (C, N)
        if pad:
            x2 = jnp.pad(x2, ((0, 0), (0, pad)))        # zeros -> dist 0
        return x2.reshape(C, S, 128)

    a3 = to_tiles(a)
    b3 = to_tiles(b)

    # Tile: ts sublanes of 128 points each (block_n points per grid step).
    ts_max = block_n // 128                             # multiple of 8
    if S <= ts_max:
        ts = S                                          # one exact full block
    else:
        ts = ts_max
    n_blocks = pl.cdiv(S, ts)
    ragged = (S % ts) != 0

    itemsize = jnp.dtype(a.dtype).itemsize
    compiler_params = pltpu.CompilerParams(
        # Independent blocks -> megacore split on v7x; harmless elsewhere.
        dimension_semantics=("parallel",),
        # Safe on every generation (v5e scoped default is 16 MiB, v7x physical
        # VMEM is 64 MiB); the f32 default tile uses ~14 MiB double-buffered.
        vmem_limit_bytes=32 * 1024 * 1024,
    )
    in_specs = [
        pl.BlockSpec((C, ts, 128), lambda i: (0, i, 0)),
        pl.BlockSpec((C, ts, 128), lambda i: (0, i, 0)),
    ]

    if reduction == "none":
        dist = pl.pallas_call(
            _dist_none_kernel,
            out_shape=jax.ShapeDtypeStruct((S, 128), a.dtype),
            grid=(n_blocks,),
            in_specs=in_specs,
            out_specs=pl.BlockSpec((ts, 128), lambda i: (i, 0)),
            compiler_params=compiler_params,
            cost_estimate=pl.CostEstimate(
                flops=3 * C * N,
                transcendentals=N,
                bytes_accessed=2 * N * C * itemsize + N * itemsize),
        )(a3, b3)
        return dist.reshape(S * 128)[:N].reshape(lead_shape)

    # reduction in ('sum', 'mean'): per-block partial sums, reduced in wrapper.
    psum = pl.pallas_call(
        functools.partial(_dist_sum_kernel, ts=ts, s_valid=S, ragged=ragged),
        out_shape=jax.ShapeDtypeStruct((1, n_blocks * 128), jnp.float32),
        grid=(n_blocks,),
        in_specs=in_specs,
        out_specs=pl.BlockSpec((1, 128), lambda i: (0, i)),
        compiler_params=compiler_params,
        cost_estimate=pl.CostEstimate(
            flops=3 * C * N,
            transcendentals=N,
            bytes_accessed=2 * N * C * itemsize + n_blocks * 512),
    )(a3, b3)
    total = jnp.sum(psum)                               # tiny tree-sum (f32)
    if reduction == "sum":
        return total.astype(a.dtype)
    return (total / jnp.float32(N)).astype(a.dtype)


if __name__ == "__main__":
    key = jax.random.PRNGKey(0)
    ka, kb = jax.random.split(key)
    # (batch=2, H=16, W=16, C=3) 3-D point maps, as the forward's shape check implies.
    a = jax.random.normal(ka, (2, 16, 16, 3), dtype=jnp.float32)
    b = jax.random.normal(kb, (2, 16, 16, 3), dtype=jnp.float32)

    out_mean = jax.block_until_ready(lloss(a, b, reduction="mean"))
    out_sum = jax.block_until_ready(lloss(a, b, reduction="sum"))
    out_none = jax.block_until_ready(lloss(a, b, reduction="none"))

    # Silent sanity checks against a pure-JAX reference.
    ref_none = jnp.linalg.norm(a - b, axis=-1)
    assert out_none.shape == a.shape[:-1]
    np.testing.assert_allclose(np.asarray(out_none), np.asarray(ref_none),
                               rtol=1e-5, atol=1e-5)
    np.testing.assert_allclose(float(out_sum), float(ref_none.sum()),
                               rtol=1e-4, atol=1e-4)
    np.testing.assert_allclose(float(out_mean), float(ref_none.mean()),
                               rtol=1e-5, atol=1e-5)

    # Multi-block + ragged-tail path: small block_n forces 2 grid steps with a
    # partial last block (N = 2*33*17 = 1122 -> S = 9 sublane-rows, ts = 8).
    kc, kd = jax.random.split(kb)
    c = jax.random.normal(kc, (2, 33, 17, 3), dtype=jnp.float32)
    d = jax.random.normal(kd, (2, 33, 17, 3), dtype=jnp.float32)
    ref2 = jnp.linalg.norm(c - d, axis=-1)
    out2_sum = jax.block_until_ready(lloss(c, d, reduction="sum", block_n=1024))
    out2_none = jax.block_until_ready(lloss(c, d, reduction="none", block_n=1024))
    np.testing.assert_allclose(float(out2_sum), float(ref2.sum()),
                               rtol=1e-4, atol=1e-4)
    np.testing.assert_allclose(np.asarray(out2_none), np.asarray(ref2),
                               rtol=1e-5, atol=1e-5)

    # bf16 path: kernel upcasts on-chip; 'none' output keeps the input dtype.
    a16 = a.astype(jnp.bfloat16)
    b16 = b.astype(jnp.bfloat16)
    out16_none = jax.block_until_ready(lloss(a16, b16, reduction="none"))
    assert out16_none.dtype == jnp.bfloat16
    out16_mean = jax.block_until_ready(lloss(a16, b16, reduction="mean"))
    ref16 = jnp.linalg.norm(a16.astype(jnp.float32) - b16.astype(jnp.float32),
                            axis=-1).mean()
    np.testing.assert_allclose(float(out16_mean), float(ref16),
                               rtol=2e-2, atol=2e-2)

    print("KERNEL_OK")
</pallas_src>

<mosaic_0001>
module attributes {stable_mosaic.version = 11 : i64} {
  func.func @_dist_sum_kernel(%arg0: i32, %arg1: memref<3x4x128xf32, #tpu.memory_space<vmem>>, %arg2: memref<3x4x128xf32, #tpu.memory_space<vmem>>, %arg3: memref<1x128xf32, #tpu.memory_space<vmem>>) attributes {dimension_semantics = [#tpu.dimension_semantics<parallel>], iteration_bounds = array<i64: 1>, scalar_prefetch = 0 : i64, scratch_operands = 0 : i64, tpu.core_type = #tpu.core_type<tc>, window_params = [{transform_indices = @transform_0, window_bounds = array<i64: 3, 4, 128>}, {transform_indices = @transform_1, window_bounds = array<i64: 3, 4, 128>}, {transform_indices = @transform_2, window_bounds = array<i64: 1, 128>}]} {
    %c0 = arith.constant 0 : index
    %c0_0 = arith.constant 0 : index
    %c0_1 = arith.constant 0 : index
    %0 = vector.load %arg1[%c0, %c0_0, %c0_1] : memref<3x4x128xf32, #tpu.memory_space<vmem>>, vector<3x4x128xf32>
    %c0_2 = arith.constant 0 : index
    %c0_3 = arith.constant 0 : index
    %c0_4 = arith.constant 0 : index
    %1 = vector.load %arg2[%c0_2, %c0_3, %c0_4] : memref<3x4x128xf32, #tpu.memory_space<vmem>>, vector<3x4x128xf32>
    %2 = arith.subf %0, %1 : vector<3x4x128xf32>
    %3 = arith.mulf %2, %2 : vector<3x4x128xf32>
    %cst = arith.constant dense<0.000000e+00> : vector<4x128xf32>
    %4 = vector.multi_reduction <add>, %3, %cst [0] : vector<3x4x128xf32> to vector<4x128xf32>
    %5 = math.sqrt %4 : vector<4x128xf32>
    %6 = tpu.iota {dimensions = array<i32: 1>} : vector<1x128xi32>
    %7 = vector.shape_cast %5 : vector<4x128xf32> to vector<1x4x128xf32>
    %cst_5 = arith.constant dense<0.000000e+00> : vector<1xf32>
    %8 = vector.multi_reduction <add>, %7, %cst_5 [1, 2] : vector<1x4x128xf32> to vector<1xf32>
    %9 = vector.shape_cast %8 : vector<1xf32> to vector<1x1x1xf32>
    %10 = vector.extract %9[0, 0, 0] : f32 from vector<1x1x1xf32>
    %c0_i32 = arith.constant 0 : i32
    %11 = vector.broadcast %c0_i32 : i32 to vector<1x128xi32>
    %12 = arith.cmpi eq, %6, %11 : vector<1x128xi32>
    %cst_6 = arith.constant 0.000000e+00 : f32
    %13 = vector.broadcast %10 : f32 to vector<1x128xf32>
    %14 = vector.broadcast %cst_6 : f32 to vector<1x128xf32>
    %15 = arith.select %12, %13, %14 : vector<1x128xi1>, vector<1x128xf32>
    %c0_7 = arith.constant 0 : index
    %c0_8 = arith.constant 0 : index
    %16 = vector.load %arg3[%c0_7, %c0_8] : memref<1x128xf32, #tpu.memory_space<vmem>>, vector<1x128xf32>
    tpu.vector_store %arg3[%c0_7, %c0_8], %15 {strides = array<i32>} : memref<1x128xf32, #tpu.memory_space<vmem>>, vector<1x128xf32>,
    return
  }
  func.func @transform_0(%arg0: i32) -> (i32, i32, i32) {
    %c0_i32 = arith.constant 0 : i32
    %c0_i32_0 = arith.constant 0 : i32
    %c0_i32_1 = arith.constant 0 : i32
    return %c0_i32, %arg0, %c0_i32_0 : i32, i32, i32
  }
  func.func @transform_1(%arg0: i32) -> (i32, i32, i32) {
    %c0_i32 = arith.constant 0 : i32
    %c0_i32_0 = arith.constant 0 : i32
    %c0_i32_1 = arith.constant 0 : i32
    return %c0_i32, %arg0, %c0_i32_0 : i32, i32, i32
  }
  func.func @transform_2(%arg0: i32) -> (i32, i32) {
    %c0_i32 = arith.constant 0 : i32
    %c0_i32_0 = arith.constant 0 : i32
    return %c0_i32, %arg0 : i32, i32
  }
}

</mosaic_0001>

<bundles_post_ra>
// kernel: lloss.1
= control target key start
LH: loop header
LB: loop body
LE: loop exit
PB: predicated region body
PF: predicated region fallthrough
CT: control target
= control target key end

     0   :  { %vm23_vm0 = vcmask 1043456   ;;  %v36_v30 = vlaneseq  ;;  %s100_s0 = inlined_call_operand.vmem [shape: f32[3,4,128], index: 0, kind: input, shape index: {}]   ;;  %s101_s1 = inlined_call_operand.vmem [shape: f32[3,4,128], index: 1, kind: input, shape index: {}]   ;;  %s102_s2 = inlined_call_operand.vmem [shape: f32[1,128], index: 2, kind: output, shape index: {}]  }
   0x1   :  { %v11_v0 = vld [vmem:[%s100_s0] sm:$0xf]  ;;  %v12_v1 = vld [vmem:[%s100_s0 + $0x4] sm:$0xf]  ;;  %v13_v2 = vld [vmem:[%s100_s0 + $0x8] sm:$0xf] }
   0x2   :  { %v14_v3 = vld [vmem:[%s101_s1] sm:$0xf]  ;;  %v15_v4 = vld [vmem:[%s101_s1 + $0x4] sm:$0xf]  ;;  %v16_v5 = vld [vmem:[%s101_s1 + $0x8] sm:$0xf] }
   0x3   :  { %v17_v6 = vsub.f32 %v11_v0, %v14_v3  ;;  %v18_v7 = vsub.f32 %v12_v1, %v15_v4  ;;  %v19_v8 = vsub.f32 %v13_v2, %v16_v5  ;;  %v37_v31 = vand.u32 127, %v36_v30 }
   0x5   :  { %v20_v9 = vmul.f32 %v17_v6, %v17_v6  ;;  %v21_v10 = vmul.f32 %v18_v7, %v18_v7  ;;  %v22_v11 = vmul.f32 %v19_v8, %v19_v8  ;;  %vm48_vm3 = vcmp.eq.s32.totalorder %v37_v31, 0 }
   0x7   :  { %v24_v12 = vsel %vm23_vm0, %v20_v9, 0.0  ;;  %v25_v13 = vsel %vm23_vm0, %v21_v10, 0.0  ;;  %v27_v14 = vsel %vm23_vm0, %v22_v11, 0.0 }
   0x8   :  { %v26_v15 = vadd.f32 %v25_v13, %v24_v12 }
   0xa   :  { %v28_v16 = vadd.f32 %v27_v14, %v26_v15 }
   0xc   :  { %58 = vrsqrt.f32 %v28_v16  ;;  %vm31_vm1 = vcmp.eq.f32.partialorder %v28_v16, inf  ;;  %v34_v18 = vand.u32 2147483648, %v28_v16  ;;  %vm33_vm2 = vcmp.eq.f32.partialorder %v28_v16, 0.0 }
  0x16   :  { %v59_v17 = vpop.eup %58 }
  0x17   :  { %v30_v19 = vmul.f32 %v59_v17, %v28_v16 }
  0x19   :  { %v32_v20 = vsel %vm31_vm1, %v28_v16, %v30_v19 }
  0x1a   :  { %v35_v21 = vsel %vm33_vm2, %v34_v18, %v32_v20 }
  0x1b   :  { %v38_v22 = vsel %vm23_vm0, %v35_v21, 0.0 }
  0x1c   :  { %39 = vadd.xlane.f32.xlu0 %v38_v22 }
  0xa9   :  { %v40_v23 = vpop.xlane.xlu0 %39 }
  0xaa   :  { %v41_v24 = vrot.slane %v40_v23, 4 }
  0xac   :  { %v42_v25 = vadd.f32 %v41_v24, %v40_v23 }
  0xae   :  { %v43_v26 = vrot.slane %v42_v25, 2 }
  0xb0   :  { %v44_v27 = vadd.f32 %v43_v26, %v42_v25 }
  0xb2   :  { %v45_v28 = vrot.slane %v44_v27, 1 }
  0xb4   :  { %v46_v29 = vadd.f32 %v45_v28, %v44_v27 }
  0xb6   :  { %56 = vpush %v46_v29 }
  0xe7   :  { %s57_s0 = spop %56 }
  0xe8   :  { %v49_v32 = vstv %s57_s0 }
  0xe9   :  { %v50_v33 = vsel %vm48_vm3, %v49_v32, 0.0 }
  0xea   :  { %51 = vst [vmem:[%s102_s2] sm:$0x1] %v50_v33 }

</bundles_post_ra>
